<compile_context>
chip_gen: v7x
topology: tpu7x:2x2x1
jax: 0.10.0
libtpu: 0.0.40
codegen_flags: <defaults>
</compile_context>

<pallas_src>
import functools
import math

import jax
import jax.numpy as jnp
from jax import lax
from jax.experimental import pallas as pl
from jax.experimental.pallas import tpu as pltpu

_NEG_LOG_1E4 = -math.log(1e-4)  # == -log(clip value) == 9.210340371976184


def _sce_partial_kernel(pred_ref, labels_ref, out_ref, *, n_total):
    i = pl.program_id(0)

    logits = pred_ref[...].astype(jnp.float32)        # (TILE_N, C)
    labels = labels_ref[...]                          # (TILE_N, 1) int32
    tn, c = logits.shape

    # Mask for rows that fall past the true batch size (padded last tile).
    row_ids = lax.broadcasted_iota(jnp.int32, (tn, 1), 0) + i * tn
    valid = row_ids < n_total                         # (TILE_N, 1) bool

    # True-class selector (replaces an explicit float one-hot).
    class_ids = lax.broadcasted_iota(jnp.int32, (tn, c), 1)
    true_mask = class_ids == labels                   # (TILE_N, C) bool

    # Numerically stable softmax pieces.
    m = jnp.max(logits, axis=1, keepdims=True)        # (TILE_N, 1)
    shifted = logits - m                              # (TILE_N, C)
    ex = jnp.exp(shifted)                             # (TILE_N, C)
    denom = jnp.sum(ex, axis=1, keepdims=True)        # (TILE_N, 1)

    # Cross entropy per row: -log_softmax[true] = log(denom) - shifted[true].
    shifted_true = jnp.sum(jnp.where(true_mask, shifted, 0.0),
                           axis=1, keepdims=True)     # (TILE_N, 1)
    ce_rows = jnp.log(denom) - shifted_true           # (TILE_N, 1)

    # Reverse cross entropy per row without log(one_hot_clipped):
    #   rce = -sum(p * log(clip(one_hot, 1e-4, 1)))
    #       = -log(1e-4) * (sum_j p_j - p_true),  p = clip(softmax, 1e-7, 1)
    softmax = ex / denom
    p = jnp.clip(softmax, 1e-7, 1.0)
    p_sum = jnp.sum(p, axis=1, keepdims=True)
    p_true = jnp.sum(jnp.where(true_mask, p, 0.0), axis=1, keepdims=True)
    rce_rows = _NEG_LOG_1E4 * (p_sum - p_true)        # (TILE_N, 1)

    ce_partial = jnp.sum(jnp.where(valid, ce_rows, 0.0))
    rce_partial = jnp.sum(jnp.where(valid, rce_rows, 0.0))

    # Lane-dense (1, 8, 128) store: [0,0,0] = CE partial, [0,0,1] = RCE partial.
    sub = lax.broadcasted_iota(jnp.int32, (1, 8, 128), 1)
    lane = lax.broadcasted_iota(jnp.int32, (1, 8, 128), 2)
    out_ref[...] = jnp.where(
        (sub == 0) & (lane == 0), ce_partial,
        jnp.where((sub == 0) & (lane == 1), rce_partial, 0.0))


def _choose_tile_n(n, c):
    # Keep a double-buffered f32 logits tile well inside the most constrained
    # default scoped-VMEM budget (v5e: 16 MiB; also safe for v7x's 64 MiB phys).
    budget_bytes = 12 * 1024 * 1024
    max_rows_by_vmem = max(8, budget_bytes // (2 * 4 * max(c, 1)))
    n_padded = ((n + 7) // 8) * 8
    tile = min(512, max_rows_by_vmem, n_padded)
    return max(8, (tile // 8) * 8)


def sce_loss(pred, labels, *, alpha, beta, num_classes=10):
    """pred: (N, C) logits (any float dtype), labels: (N,) int class ids."""
    n, c = pred.shape
    labels2d = labels.astype(jnp.int32).reshape(n, 1)

    tile_n = _choose_tile_n(n, c)
    num_tiles = pl.cdiv(n, tile_n)

    kernel = functools.partial(_sce_partial_kernel, n_total=n)

    partials = pl.pallas_call(
        kernel,
        out_shape=jax.ShapeDtypeStruct((num_tiles, 8, 128), jnp.float32),
        grid=(num_tiles,),
        in_specs=[
            pl.BlockSpec((tile_n, c), lambda i: (i, 0)),
            pl.BlockSpec((tile_n, 1), lambda i: (i, 0)),
        ],
        out_specs=pl.BlockSpec((1, 8, 128), lambda i: (i, 0, 0)),
        compiler_params=pltpu.CompilerParams(
            dimension_semantics=("parallel",),
            vmem_limit_bytes=64 * 1024 * 1024,
        ),
    )(pred, labels2d)

    ce = jnp.sum(partials[:, 0, 0]) / jnp.float32(n)
    rce = jnp.sum(partials[:, 0, 1]) / jnp.float32(n)
    return jnp.float32(alpha) * ce + jnp.float32(beta) * rce


if __name__ == "__main__":
    key = jax.random.PRNGKey(0)
    k_pred, k_lab = jax.random.split(key)

    batch = 8
    num_classes = 10
    alpha, beta = 0.1, 1.0

    pred = jax.random.normal(k_pred, (batch, num_classes), dtype=jnp.float32)
    labels = jax.random.randint(k_lab, (batch,), 0, num_classes, dtype=jnp.int32)

    loss = sce_loss(pred, labels, alpha=alpha, beta=beta, num_classes=num_classes)
    jax.block_until_ready(loss)

    # Pure-JAX reference (same math as the PyTorch module).
    log_sm = pred - jax.scipy.special.logsumexp(pred, axis=1, keepdims=True)
    one_hot = jax.nn.one_hot(labels, num_classes, dtype=jnp.float32)
    ce_ref = jnp.mean(-jnp.sum(one_hot * log_sm, axis=1))
    sm = jnp.clip(jax.nn.softmax(pred, axis=1), 1e-07, 1.0)
    rce_ref = jnp.mean(-jnp.sum(sm * jnp.log(jnp.clip(one_hot, 0.0001, 1.0)), axis=1))
    loss_ref = alpha * ce_ref + beta * rce_ref

    assert jnp.allclose(loss, loss_ref, rtol=1e-5, atol=1e-5), (loss, loss_ref)
    print("KERNEL_OK")
</pallas_src>

<mosaic_0001>
module attributes {stable_mosaic.version = 11 : i64} {
  func.func @_sce_partial_kernel(%arg0: i32, %arg1: memref<8x10xf32, #tpu.memory_space<vmem>>, %arg2: memref<8x1xi32, #tpu.memory_space<vmem>>, %arg3: memref<1x8x128xf32, #tpu.memory_space<vmem>>) attributes {dimension_semantics = [#tpu.dimension_semantics<parallel>], iteration_bounds = array<i64: 1>, scalar_prefetch = 0 : i64, scratch_operands = 0 : i64, tpu.core_type = #tpu.core_type<tc>, window_params = [{transform_indices = @transform_0, window_bounds = array<i64: 8, 10>}, {transform_indices = @transform_1, window_bounds = array<i64: 8, 1>}, {transform_indices = @transform_2, window_bounds = array<i64: 1, 8, 128>}]} {
    %c0 = arith.constant 0 : index
    %c0_0 = arith.constant 0 : index
    %0 = vector.load %arg1[%c0, %c0_0] : memref<8x10xf32, #tpu.memory_space<vmem>>, vector<8x10xf32>
    %c0_1 = arith.constant 0 : index
    %c0_2 = arith.constant 0 : index
    %1 = vector.load %arg2[%c0_1, %c0_2] : memref<8x1xi32, #tpu.memory_space<vmem>>, vector<8x1xi32>
    %2 = tpu.iota {dimensions = array<i32: 0>} : vector<8x1xi32>
    %c8_i32 = arith.constant 8 : i32
    %3 = arith.muli %arg0, %c8_i32 : i32
    %4 = vector.broadcast %3 : i32 to vector<8x1xi32>
    %5 = arith.addi %2, %4 : vector<8x1xi32>
    %c8_i32_3 = arith.constant 8 : i32
    %6 = vector.broadcast %c8_i32_3 : i32 to vector<8x1xi32>
    %7 = arith.cmpi slt, %5, %6 : vector<8x1xi32>
    %8 = tpu.iota {dimensions = array<i32: 1>} : vector<8x10xi32>
    %9 = vector.broadcast %1 : vector<8x1xi32> to vector<8x10xi32>
    %10 = arith.cmpi eq, %8, %9 : vector<8x10xi32>
    %cst = arith.constant dense<0xFF800000> : vector<8xf32>
    %11 = vector.multi_reduction <maximumf>, %0, %cst [1] : vector<8x10xf32> to vector<8xf32>
    %12 = vector.shape_cast %11 : vector<8xf32> to vector<8x1xf32>
    %13 = vector.broadcast %12 : vector<8x1xf32> to vector<8x10xf32>
    %14 = arith.subf %0, %13 : vector<8x10xf32>
    %15 = math.exp %14 : vector<8x10xf32>
    %cst_4 = arith.constant dense<0.000000e+00> : vector<8xf32>
    %16 = vector.multi_reduction <add>, %15, %cst_4 [1] : vector<8x10xf32> to vector<8xf32>
    %17 = vector.shape_cast %16 : vector<8xf32> to vector<8x1xf32>
    %cst_5 = arith.constant 0.000000e+00 : f32
    %18 = vector.broadcast %cst_5 : f32 to vector<8x10xf32>
    %19 = arith.select %10, %14, %18 : vector<8x10xi1>, vector<8x10xf32>
    %cst_6 = arith.constant dense<0.000000e+00> : vector<8xf32>
    %20 = vector.multi_reduction <add>, %19, %cst_6 [1] : vector<8x10xf32> to vector<8xf32>
    %21 = vector.shape_cast %20 : vector<8xf32> to vector<8x1xf32>
    %22 = math.log %17 : vector<8x1xf32>
    %23 = arith.subf %22, %21 : vector<8x1xf32>
    %24 = vector.broadcast %17 : vector<8x1xf32> to vector<8x10xf32>
    %25 = arith.divf %15, %24 : vector<8x10xf32>
    %cst_7 = arith.constant 1.000000e-07 : f32
    %cst_8 = arith.constant 1.000000e+00 : f32
    %26 = vector.broadcast %cst_7 : f32 to vector<8x10xf32>
    %27 = arith.maximumf %26, %25 : vector<8x10xf32>
    %28 = vector.broadcast %cst_8 : f32 to vector<8x10xf32>
    %29 = arith.minimumf %28, %27 : vector<8x10xf32>
    %cst_9 = arith.constant dense<0.000000e+00> : vector<8xf32>
    %30 = vector.multi_reduction <add>, %29, %cst_9 [1] : vector<8x10xf32> to vector<8xf32>
    %31 = vector.shape_cast %30 : vector<8xf32> to vector<8x1xf32>
    %cst_10 = arith.constant 0.000000e+00 : f32
    %32 = vector.broadcast %cst_10 : f32 to vector<8x10xf32>
    %33 = arith.select %10, %29, %32 : vector<8x10xi1>, vector<8x10xf32>
    %cst_11 = arith.constant dense<0.000000e+00> : vector<8xf32>
    %34 = vector.multi_reduction <add>, %33, %cst_11 [1] : vector<8x10xf32> to vector<8xf32>
    %35 = vector.shape_cast %34 : vector<8xf32> to vector<8x1xf32>
    %36 = arith.subf %31, %35 : vector<8x1xf32>
    %cst_12 = arith.constant 9.21034049 : f32
    %37 = vector.broadcast %cst_12 : f32 to vector<8x1xf32>
    %38 = arith.mulf %37, %36 : vector<8x1xf32>
    %cst_13 = arith.constant 0.000000e+00 : f32
    %39 = vector.broadcast %cst_13 : f32 to vector<8x1xf32>
    %40 = arith.select %7, %23, %39 : vector<8x1xi1>, vector<8x1xf32>
    %41 = vector.shape_cast %40 : vector<8x1xf32> to vector<1x8x1xf32>
    %cst_14 = arith.constant dense<0.000000e+00> : vector<1xf32>
    %42 = vector.multi_reduction <add>, %41, %cst_14 [1, 2] : vector<1x8x1xf32> to vector<1xf32>
    %43 = vector.shape_cast %42 : vector<1xf32> to vector<1x1x1xf32>
    %44 = vector.extract %43[0, 0, 0] : f32 from vector<1x1x1xf32>
    %cst_15 = arith.constant 0.000000e+00 : f32
    %45 = vector.broadcast %cst_15 : f32 to vector<8x1xf32>
    %46 = arith.select %7, %38, %45 : vector<8x1xi1>, vector<8x1xf32>
    %47 = vector.shape_cast %46 : vector<8x1xf32> to vector<1x8x1xf32>
    %cst_16 = arith.constant dense<0.000000e+00> : vector<1xf32>
    %48 = vector.multi_reduction <add>, %47, %cst_16 [1, 2] : vector<1x8x1xf32> to vector<1xf32>
    %49 = vector.shape_cast %48 : vector<1xf32> to vector<1x1x1xf32>
    %50 = vector.extract %49[0, 0, 0] : f32 from vector<1x1x1xf32>
    %51 = tpu.iota {dimensions = array<i32: 1>} : vector<1x8x128xi32>
    %52 = tpu.iota {dimensions = array<i32: 2>} : vector<1x8x128xi32>
    %c0_i32 = arith.constant 0 : i32
    %53 = vector.broadcast %c0_i32 : i32 to vector<1x8x128xi32>
    %54 = arith.cmpi eq, %51, %53 : vector<1x8x128xi32>
    %c0_i32_17 = arith.constant 0 : i32
    %55 = vector.broadcast %c0_i32_17 : i32 to vector<1x8x128xi32>
    %56 = arith.cmpi eq, %52, %55 : vector<1x8x128xi32>
    %57 = arith.andi %54, %56 : vector<1x8x128xi1>
    %c0_i32_18 = arith.constant 0 : i32
    %58 = vector.broadcast %c0_i32_18 : i32 to vector<1x8x128xi32>
    %59 = arith.cmpi eq, %51, %58 : vector<1x8x128xi32>
    %c1_i32 = arith.constant 1 : i32
    %60 = vector.broadcast %c1_i32 : i32 to vector<1x8x128xi32>
    %61 = arith.cmpi eq, %52, %60 : vector<1x8x128xi32>
    %62 = arith.andi %59, %61 : vector<1x8x128xi1>
    %cst_19 = arith.constant 0.000000e+00 : f32
    %63 = vector.broadcast %50 : f32 to vector<1x8x128xf32>
    %64 = vector.broadcast %cst_19 : f32 to vector<1x8x128xf32>
    %65 = arith.select %62, %63, %64 : vector<1x8x128xi1>, vector<1x8x128xf32>
    %66 = vector.broadcast %44 : f32 to vector<1x8x128xf32>
    %67 = arith.select %57, %66, %65 : vector<1x8x128xi1>, vector<1x8x128xf32>
    %c0_20 = arith.constant 0 : index
    %c0_21 = arith.constant 0 : index
    %c0_22 = arith.constant 0 : index
    %68 = vector.load %arg3[%c0_20, %c0_21, %c0_22] : memref<1x8x128xf32, #tpu.memory_space<vmem>>, vector<1x8x128xf32>
    tpu.vector_store %arg3[%c0_20, %c0_21, %c0_22], %67 {strides = array<i32>} : memref<1x8x128xf32, #tpu.memory_space<vmem>>, vector<1x8x128xf32>,
    return
  }
  func.func @transform_0(%arg0: i32) -> (i32, i32) {
    %c0_i32 = arith.constant 0 : i32
    %c0_i32_0 = arith.constant 0 : i32
    return %arg0, %c0_i32 : i32, i32
  }
  func.func @transform_1(%arg0: i32) -> (i32, i32) {
    %c0_i32 = arith.constant 0 : i32
    %c0_i32_0 = arith.constant 0 : i32
    return %arg0, %c0_i32 : i32, i32
  }
  func.func @transform_2(%arg0: i32) -> (i32, i32, i32) {
    %c0_i32 = arith.constant 0 : i32
    %c0_i32_0 = arith.constant 0 : i32
    %c0_i32_1 = arith.constant 0 : i32
    return %arg0, %c0_i32, %c0_i32_0 : i32, i32, i32
  }
}

</mosaic_0001>

<bundles_post_ra>
// kernel: tpu_custom_call.1
= control target key start
LH: loop header
LB: loop body
LE: loop exit
PB: predicated region body
PF: predicated region fallthrough
CT: control target
= control target key end

     0   :  { %7 = vsyncpa [#allocation3], 0  ;;  %s277_s0 = inlined_call_operand.hbm [shape: f32[8,10], index: 0, kind: input, shape index: {}]   ;;  %s278_s1 = inlined_call_operand.hbm [shape: s32[8,1], index: 1, kind: input, shape index: {}]   ;;  %s279_s2 = inlined_call_operand.hbm [shape: f32[1,8,128], index: 2, kind: output, shape index: {}]  }
   0x1   :  { %8 = vsyncpa [#allocation6], 0 }
   0x2   :  { %9 = vsyncpa [#allocation4], 0  ;;  %s217_s9 = smov [#allocation2]   ;;  %s218_s11 = smov [#allocation5]  }
   0x3   :  { %s16_s10 = sshll.u32 %s217_s9, 4  ;;  %s26_s12 = sshll.u32 %s218_s11, 4  ;;  %s17_s10 = int_to_ptr.vmem [resolvable:$true] %s16_s10  ;;  %s27_s12 = int_to_ptr.vmem [resolvable:$true] %s26_s12 }
   0x4   :  { %s145_s15 = scalar_lea.hbm %s277_s0, 128 }
   0x5   :  { %p146_p0 = scmp.ne.s32.totalorder %s277_s0, %s145_s15  ;;  %p149_p1 = scmp.lt.u32.totalorder %s145_s15, %s277_s0 }
   0x7   :  { %p151_p2 = pnand %p149_p1, %p146_p0 }
   0x9   :  { %154 = shalt.err (!%p151_p2)
}
   0xa   :  { %s155_s20 = scalar_lea.vmem %s17_s10, 128  ;;  %p160_p4 = scmp.lt.s32.totalorder %s17_s10, %s17_s10 }
   0xb   :  { %p156_p3 = scmp.ne.s32.totalorder %s17_s10, %s155_s20  ;;  %p161_p5 = scmp.lt.s32.totalorder %s155_s20, %s155_s20 }
   0xd   :  { %p162_p6 = por %p161_p5, %p160_p4 }
   0xf   :  { %p163_p7 = pnand %p162_p6, %p156_p3 }
  0x11   :  { %166 = shalt.err (!%p163_p7)
}
  0x12   :  { %19 = dma.hbm_to_vmem [thread:$0]  %s277_s0, 128, %s17_s10, [#allocation3]  }
  0x13   :  { %s167_s25 = scalar_lea.hbm %s278_s1, 128 }
  0x14   :  { %p168_p8 = scmp.ne.s32.totalorder %s278_s1, %s167_s25  ;;  %p171_p9 = scmp.lt.u32.totalorder %s167_s25, %s278_s1 }
  0x16   :  { %p173_p10 = pnand %p171_p9, %p168_p8 }
  0x18   :  { %176 = shalt.err (!%p173_p10)
}
  0x19   :  { %s177_s30 = scalar_lea.vmem %s27_s12, 128  ;;  %p182_p12 = scmp.lt.s32.totalorder %s27_s12, %s27_s12 }
  0x1a   :  { %p178_p11 = scmp.ne.s32.totalorder %s27_s12, %s177_s30  ;;  %p183_p13 = scmp.lt.s32.totalorder %s177_s30, %s177_s30 }
  0x1c   :  { %p184_p0 = por %p183_p13, %p182_p12 }
  0x1e   :  { %p185_p1 = pnand %p184_p0, %p178_p11 }
  0x20   :  { %188 = shalt.err (!%p185_p1)
}
  0x21   :  { %29 = dma.hbm_to_vmem [thread:$0]  %s278_s1, 128, %s27_s12, [#allocation6]  }
  0x22   :  { %211 = dma.done.wait [#allocation3], 128  }
  0x23   :  { %212 = vsyncadd [#allocation3], 4294967168 }
  0x24   :  { %213 = dma.done.wait [#allocation6], 128  }
  0x25   :  { %214 = vsyncadd [#allocation6], 4294967168  ;;  %v219_v0 = vmov 0   ;;  %vm50_vm0 = vcmask 80896   ;;  %v36_v1 = vld [vmem:[#allocation2] sm:$0xff]  ;;  %v37_v2 = vld [vmem:[#allocation5] sm:$0xff]  ;;  %v38_v10 = vlaneseq }
  0x26   :  { %137 = vset.pattern.permute.xlu1 %v219_v0  ;;  %138 = vset.pattern.permute.xlu0 %v219_v0  ;;  %v51_v3 = vsel %vm50_vm0, %v36_v1, -inf  ;;  %vm81_vm2 = vcmask 7168   ;;  %s220_s4 = smov [#allocation7]  }
  0x27   :  { %47 = vperm.xlu1 %137, %v37_v2   ;;  %52 = vmax.xlane.f32.xlu0 %v51_v3  ;;  %v45_v13 = vand.u32 127, %v38_v10  ;;  %v39_v46 = vshrl.u32 %v38_v10, 7  ;;  %s119_s5 = sshll.u32 %s220_s4, 4  ;;  %s120_s5 = int_to_ptr.vmem [resolvable:$true] %s119_s5 }
  0x28   :  { %s189_s7 = scalar_lea.vmem %s120_s5, 128  ;;  %p194_p3 = scmp.lt.s32.totalorder %s120_s5, %s120_s5 }
  0x29   :  { %vm103_vm3 = vcmp.eq.s32.totalorder %v39_v46, 0  ;;  %vm106_vm4 = vcmp.eq.s32.totalorder %v45_v13, 1  ;;  %vm104_vm5 = vcmp.eq.s32.totalorder %v45_v13, 0  ;;  %p190_p2 = scmp.ne.s32.totalorder %s120_s5, %s189_s7  ;;  %p195_p4 = scmp.lt.s32.totalorder %s189_s7, %s189_s7 }
  0x2a   :  { %vm107_vm6 = vmand %vm103_vm3, %vm106_vm4 }
  0x2b   :  { %vm105_vm7 = vmand %vm103_vm3, %vm104_vm5  ;;  %p196_p5 = por %p195_p4, %p194_p3 }
  0x2d   :  { %p197_p6 = pnand %p196_p5, %p190_p2 }
  0xa6   :  { %v48_v14 = vpop.permute.xlu1 %47 }
  0xa7   :  { %vm49_vm1 = vcmp.eq.s32.totalorder %v45_v13, %v48_v14 }
  0xb4   :  { %v53_v4 = vpop.xlane.xlu0 %52 }
  0xb5   :  { %v54_v5 = vsub.f32 %v36_v1, %v53_v4 }
  0xb7   :  { %v55_v6 = vmul.f32 1.442695, %v54_v5  ;;  %v60_v20 = vsel %vm49_vm1, %v54_v5, 0.0 }
  0xb8   :  { %v61_v21 = vsel %vm50_vm0, %v60_v20, 0.0 }
  0xb9   :  { %139 = vpow2.f32 %v55_v6 }
  0xc3   :  { %v140_v7 = vpop.eup %139 }
  0xc4   :  { %v57_v8 = vsel %vm50_vm0, %v140_v7, 0.0 }
  0xc5   :  { %58 = vadd.xlane.f32.xlu0 %v57_v8 }
 0x152   :  { %v59_v9 = vpop.xlane.xlu0 %58 }
 0x153   :  { %141 = vrcp.f32 %v59_v9 }
 0x154   :  { %143 = vlog2.f32 %v59_v9 }
 0x15d   :  { %v142_v11 = vpop.eup %141 }
 0x15e   :  { %v68_v12 = vmul.f32 %v142_v11, %v140_v7  ;;  %v144_v22 = vpop.eup %143 }
 0x15f   :  { %v65_v26 = vmul.f32 0.6931472, %v144_v22 }
 0x160   :  { %v69_v15 = vmax.f32 %v68_v12, 1e-07 }
 0x162   :  { %v70_v16 = vmin.f32 %v69_v15, 1.0 }
 0x164   :  { %v71_v17 = vsel %vm50_vm0, %v70_v16, 0.0  ;;  %v74_v18 = vsel %vm49_vm1, %v70_v16, 0.0 }
 0x165   :  { %72 = vadd.xlane.f32.xlu1 %v71_v17  ;;  %v75_v19 = vsel %vm50_vm0, %v74_v18, 0.0 }
 0x166   :  { %76 = vadd.xlane.f32.xlu0 %v75_v19 }
 0x16a   :  { %62 = vadd.xlane.f32.xlu0 %v61_v21 }
 0x1f2   :  { %v73_v23 = vpop.xlane.xlu1 %72 }
 0x1f3   :  { %v77_v24 = vpop.xlane.xlu0 %76 }
 0x1f4   :  { %v78_v25 = vsub.f32 %v73_v23, %v77_v24 }
 0x1f6   :  { %v79_v29 = vmul.f32 9.2103405, %v78_v25 }
 0x1f7   :  { %v63_v27 = vpop.xlane.xlu0 %62 }
 0x1f8   :  { %v66_v28 = vsub.f32 %v65_v26, %v63_v27  ;;  %v93_v31 = vsel %vm81_vm2, %v79_v29, 0.0 }
 0x1fa   :  { %v82_v30 = vsel %vm81_vm2, %v66_v28, 0.0 }
 0x1fb   :  { %83 = vadd.xlane.f32.xlu0 %v82_v30 }
 0x1ff   :  { %94 = vadd.xlane.f32.xlu0 %v93_v31 }
 0x288   :  { %v84_v32 = vpop.xlane.xlu0 %83 }
 0x289   :  { %v85_v33 = vrot.slane %v84_v32, 4 }
 0x28b   :  { %v86_v34 = vadd.f32 %v85_v33, %v84_v32 }
 0x28c   :  { %v95_v35 = vpop.xlane.xlu0 %94 }
 0x28d   :  { %v87_v36 = vrot.slane %v86_v34, 2  ;;  %v96_v37 = vrot.slane %v95_v35, 4 }
 0x28f   :  { %v97_v38 = vadd.f32 %v96_v37, %v95_v35  ;;  %v88_v39 = vadd.f32 %v87_v36, %v86_v34 }
 0x291   :  { %v98_v40 = vrot.slane %v97_v38, 2  ;;  %v89_v41 = vrot.slane %v88_v39, 1 }
 0x293   :  { %v99_v42 = vadd.f32 %v98_v40, %v97_v38  ;;  %v90_v43 = vadd.f32 %v89_v41, %v88_v39 }
 0x295   :  { %129 = vpush %v90_v43  ;;  %v100_v44 = vrot.slane %v99_v42, 1 }
 0x297   :  { %v101_v45 = vadd.f32 %v100_v44, %v99_v42 }
 0x299   :  { %131 = vpush %v101_v45 }
 0x2c6   :  { %s130_s1 = spop %129 }
 0x2c7   :  { %v110_v48 = vstv %s130_s1 }
 0x2ca   :  { %s132_s6 = spop %131 }
 0x2cb   :  { %v108_v47 = vstv %s132_s6 }
 0x2cc   :  { %v109_v49 = vsel %vm107_vm6, %v108_v47, 0.0 }
 0x2cd   :  { %v111_v50 = vsel %vm105_vm7, %v110_v48, %v109_v49 }
 0x2ce   :  { %112 = vst [vmem:[#allocation7] sm:$0xff] %v111_v50 }
 0x2cf   :  { %200 = shalt.err (!%p197_p6)
}
 0x2d0   :  { %s201_s10 = scalar_lea.hbm %s279_s2, 128 }
 0x2d1   :  { %p202_p7 = scmp.ne.s32.totalorder %s279_s2, %s201_s10  ;;  %p205_p8 = scmp.lt.u32.totalorder %s201_s10, %s279_s2 }
 0x2d3   :  { %p207_p9 = pnand %p205_p8, %p202_p7 }
 0x2d5   :  { %210 = shalt.err (!%p207_p9)
}
 0x2d6   :  { %122 = dma.vmem_to_hbm [thread:$0]  %s120_s5, 128, %s279_s2, [#allocation4]  }
 0x2d7   :  { %215 = dma.done.wait [#allocation4], 128  }
 0x2d8   :  { %216 = vsyncadd [#allocation4], 4294967168 }
 0x2d9   :  { %126 = vsyncpa [#allocation3], 1 }
 0x2da   :  { %127 = vsyncpa [#allocation6], 1 }
 0x2db   :  { %128 = vsyncpa [#allocation4], 1 }

</bundles_post_ra>
